<compile_context>
chip_gen: v6e
topology: v6e:2x2x1
jax: 0.10.0
libtpu: 0.0.40
codegen_flags: <defaults>
</compile_context>

<pallas_src>
import functools

import jax
import jax.numpy as jnp
from jax.experimental import pallas as pl
from jax.experimental.pallas import tpu as pltpu


def _round_up(x: int, m: int) -> int:
    return ((x + m - 1) // m) * m


# ----------------------------- Pallas kernel ------------------------------ #
def _mlp_kernel(*refs, num_layers: int):
    """Fused MLP for one batch tile.

    refs = (x_ref, w0_ref, ..., w{L-1}_ref, b_packed_ref, o_ref)

    x_ref:        (B_tile, in_dim)  f32  VMEM (pipelined over the batch grid)
    w_i_ref:      (fan_in_i, fan_out_pad_i)  bf16  VMEM (resident, single-buffered)
    b_packed_ref: (num_layers, max_out_pad)  f32   VMEM (resident, single-buffered)
    o_ref:        (B_tile, out_pad) f32  VMEM
    """
    x_ref = refs[0]
    w_refs = refs[1:1 + num_layers]
    b_ref = refs[1 + num_layers]
    o_ref = refs[2 + num_layers]

    h = x_ref[...]  # f32 activations stay on-chip across all layers
    for i in range(num_layers):
        w = w_refs[i][...]                               # bf16 (fan_in, fo_pad)
        fo_pad = w.shape[1]
        b = b_ref[i:i + 1, :fo_pad]                      # f32 (1, fo_pad), lane-aligned slice
        # bf16 MXU inputs, f32 accumulation.
        y = jnp.dot(h.astype(jnp.bfloat16), w,
                    preferred_element_type=jnp.float32) + b
        if i < num_layers - 1:                           # ReLU on all but the output layer
            y = jnp.maximum(y, 0.0)
        h = y
    o_ref[...] = h.astype(o_ref.dtype)


# ------------------------------ wrapper (glue) ------------------------------ #
_RESIDENT_SINGLE_BUFFER_OK = True  # flipped off if this JAX lacks pipeline_mode support


def pallas_mlp_forward(params, x, num_layers: int, *, batch_tile: int = 512):
    """Single fused pallas_call for the whole MLP forward pass.

    params: list of (W, b) with W stored as (in_features, out_features).
    x:      (B, input_size)
    """
    global _RESIDENT_SINGLE_BUFFER_OK

    x = x.astype(jnp.float32)                            # matches torch x.float(); cast ONCE
    B, in_dim = x.shape
    out_dim = params[-1][0].shape[1]

    # Lane-dense padded fan-out dims (multiples of 128).  fan_in of layer 0 stays at the
    # real input dim so x needs no feature padding (block last dim == full array dim).
    layer_out_pads = [_round_up(w.shape[1], 128) for (w, _) in params]
    out_pad = layer_out_pads[-1]
    max_b_pad = max(layer_out_pads)

    # Batch tiling: multiple of 8 sublanes.  Prefer >= 2 grid steps (v7x: both TCs work
    # on the "parallel" axis) while keeping tiles >= 128 rows (MXU fill on v6e/v5e).
    b_tile = min(batch_tile, _round_up(max(B, 1), 8))
    if b_tile >= 256 and -(-B // b_tile) < 2:
        b_tile = _round_up(-(-b_tile // 2), 8)
    B_pad = _round_up(B, b_tile)
    grid = (B_pad // b_tile,)

    # Pad the batch only when needed (no feature-dim inflation, no extra HBM copy of x
    # in the common case).
    x_p = x if B_pad == B else jnp.pad(x, ((0, B_pad - B), (0, 0)))

    # Pad weights (fan_out -> 128 multiple; fan_in -> previous padded fan_out), cast to
    # bf16; pack all biases (f32) into one 2-D table.
    w_list = []
    b_packed = jnp.zeros((num_layers, max_b_pad), jnp.float32)
    prev_pad = in_dim
    for i, (w, b) in enumerate(params):
        fi, fo = w.shape
        fo_pad = layer_out_pads[i]
        wp = jnp.zeros((prev_pad, fo_pad), jnp.float32).at[:fi, :fo].set(
            w.astype(jnp.float32))
        w_list.append(wp.astype(jnp.bfloat16))
        b_packed = b_packed.at[i, :fo].set(b.astype(jnp.float32))
        prev_pad = fo_pad

    # Advisory cost estimate reflecting the padded work actually executed.
    flops = 0
    prev_pad = in_dim
    for fo_pad in layer_out_pads:
        flops += 2 * B_pad * prev_pad * fo_pad
        prev_pad = fo_pad
    bytes_accessed = int(
        x_p.size * 4                                  # f32 input tiles
        + sum(wp.size for wp in w_list) * 2           # bf16 resident weights
        + b_packed.size * 4                           # f32 bias table
        + B_pad * out_pad * 4)                        # f32 output tiles

    kernel = functools.partial(_mlp_kernel, num_layers=num_layers)

    def _call(single_buffer_resident: bool):
        resident_kw = (
            dict(pipeline_mode=pl.Buffered(1)) if single_buffer_resident else {})
        # x / out tiled over the batch grid; weights + bias table resident at block (0,0).
        in_specs = [pl.BlockSpec((b_tile, in_dim), lambda i: (i, 0))]
        for wp in w_list:
            in_specs.append(pl.BlockSpec(wp.shape, lambda i: (0, 0), **resident_kw))
        in_specs.append(
            pl.BlockSpec((num_layers, max_b_pad), lambda i: (0, 0), **resident_kw))
        out_spec = pl.BlockSpec((b_tile, out_pad), lambda i: (i, 0))

        return pl.pallas_call(
            kernel,
            out_shape=jax.ShapeDtypeStruct((B_pad, out_pad), jnp.float32),
            grid=grid,
            in_specs=in_specs,
            out_specs=out_spec,
            compiler_params=pltpu.CompilerParams(
                dimension_semantics=("parallel",),
                vmem_limit_bytes=64 * 1024 * 1024),
            cost_estimate=pl.CostEstimate(
                flops=flops, transcendentals=0, bytes_accessed=bytes_accessed),
        )(x_p, *w_list, b_packed)

    if _RESIDENT_SINGLE_BUFFER_OK:
        try:
            out_p = _call(True)
        except Exception:
            # Fallback for JAX builds where pallas_call BlockSpecs reject pipeline_mode:
            # identical semantics, resident blocks just use the default double buffer.
            _RESIDENT_SINGLE_BUFFER_OK = False
            out_p = _call(False)
    else:
        out_p = _call(False)

    return out_p[:B, :out_dim]


# --------------------------- Network (MLP) params --------------------------- #
def init_network_params(key, input_size, output_size, hidden_size=256, num_layers=2):
    """Deterministic parameter init matching the PyTorch module's shapes.

    Returns a list of (W, b) with W stored as (in_features, out_features).
    """
    assert num_layers >= 1 and hidden_size >= 1 and output_size >= 1 and input_size >= 1

    def linear_init(k, fan_in, fan_out):
        kw, kb = jax.random.split(k)
        bound = 1.0 / jnp.sqrt(jnp.float32(fan_in))
        w = jax.random.uniform(kw, (fan_in, fan_out), jnp.float32, -bound, bound)
        b = jax.random.uniform(kb, (fan_out,), jnp.float32, -bound, bound)
        return w, b

    params = []
    if num_layers == 1:
        k0, _ = jax.random.split(key)
        params.append(linear_init(k0, input_size, output_size))
        return params

    keys = jax.random.split(key, num_layers)
    params.append(linear_init(keys[0], input_size, hidden_size))           # self.input
    for i in range(num_layers - 2):                                        # self.hidden_layers
        params.append(linear_init(keys[1 + i], hidden_size, hidden_size))
    params.append(linear_init(keys[-1], hidden_size, output_size))         # self.output
    return params


def network_forward_ref(params, x, num_layers, *, compute_dtype=jnp.float32):
    """Pure-JAX reference.  compute_dtype=bf16 mirrors the kernel's MXU precision."""
    x = x.astype(jnp.float32)

    def lin(h, w, b):
        return jnp.dot(h.astype(compute_dtype), w.astype(compute_dtype),
                       preferred_element_type=jnp.float32) + b.astype(jnp.float32)

    if num_layers == 1:
        w, b = params[0]
        return lin(x, w, b)
    w, b = params[0]
    h = jnp.maximum(lin(x, w, b), 0.0)
    for w, b in params[1:-1]:
        h = jnp.maximum(lin(h, w, b), 0.0)
    w, b = params[-1]
    return lin(h, w, b)


# ---------------------------------- main ----------------------------------- #
if __name__ == "__main__":
    key = jax.random.PRNGKey(0)
    k_params, k_x = jax.random.split(key)

    # Small shapes consistent with the module: batch=8, input=32, hidden=32, output=16.
    batch, input_size, hidden_size, output_size, num_layers = 8, 32, 32, 16, 3

    params = init_network_params(k_params, input_size, output_size,
                                 hidden_size=hidden_size, num_layers=num_layers)
    x = jax.random.normal(k_x, (batch, input_size), dtype=jnp.float32)

    out = jax.block_until_ready(pallas_mlp_forward(params, x, num_layers))
    ref_bf16 = network_forward_ref(params, x, num_layers, compute_dtype=jnp.bfloat16)
    ref_f32 = network_forward_ref(params, x, num_layers)
    assert out.shape == (batch, output_size)
    assert jnp.allclose(out, ref_bf16, atol=2e-3, rtol=2e-3), "mismatch vs bf16 ref (L=3)"
    assert jnp.allclose(out, ref_f32, atol=5e-2, rtol=5e-2), "mismatch vs f32 ref (L=3)"

    # Single-layer variant (y = x @ W + b, no ReLU).
    params1 = init_network_params(k_params, input_size, output_size,
                                  hidden_size=hidden_size, num_layers=1)
    out1 = jax.block_until_ready(pallas_mlp_forward(params1, x, 1))
    ref1 = network_forward_ref(params1, x, 1, compute_dtype=jnp.bfloat16)
    assert jnp.allclose(out1, ref1, atol=2e-3, rtol=2e-3), "mismatch (num_layers=1)"

    # Multi-tile batch grid (3 grid steps of 8 rows; tiny-B correctness test only).
    k_x2, k_x3 = jax.random.split(k_x)
    x2 = jax.random.normal(k_x2, (24, input_size), dtype=jnp.float32)
    out2 = jax.block_until_ready(pallas_mlp_forward(params, x2, num_layers, batch_tile=8))
    ref2 = network_forward_ref(params, x2, num_layers, compute_dtype=jnp.bfloat16)
    assert out2.shape == (24, output_size)
    assert jnp.allclose(out2, ref2, atol=2e-3, rtol=2e-3), "mismatch (batch grid)"

    # Larger batch: default tile path splits into >= 2 grid steps (v7x both-TC path).
    x3 = jax.random.normal(k_x3, (512, input_size), dtype=jnp.float32)
    out3 = jax.block_until_ready(pallas_mlp_forward(params, x3, num_layers))
    ref3 = network_forward_ref(params, x3, num_layers, compute_dtype=jnp.bfloat16)
    assert out3.shape == (512, output_size)
    assert jnp.allclose(out3, ref3, atol=2e-3, rtol=2e-3), "mismatch (2-step grid)"

    print("KERNEL_OK")
</pallas_src>

<mosaic_0001>
module attributes {stable_mosaic.version = 11 : i64} {
  func.func @_mlp_kernel(%arg0: i32, %arg1: memref<8x32xf32, #tpu.memory_space<vmem>>, %arg2: memref<32x128xbf16, #tpu.memory_space<vmem>>, %arg3: memref<128x128xbf16, #tpu.memory_space<vmem>>, %arg4: memref<128x128xbf16, #tpu.memory_space<vmem>>, %arg5: memref<3x128xf32, #tpu.memory_space<vmem>>, %arg6: memref<8x128xf32, #tpu.memory_space<vmem>>) attributes {dimension_semantics = [#tpu.dimension_semantics<parallel>], iteration_bounds = array<i64: 1>, scalar_prefetch = 0 : i64, scratch_operands = 0 : i64, tpu.core_type = #tpu.core_type<tc>, window_params = [{transform_indices = @transform_0, window_bounds = array<i64: 8, 32>}, {pipeline_mode = #tpu.pipeline_mode<synchronous>, transform_indices = @transform_1, window_bounds = array<i64: 32, 128>}, {pipeline_mode = #tpu.pipeline_mode<synchronous>, transform_indices = @transform_2, window_bounds = array<i64: 128, 128>}, {pipeline_mode = #tpu.pipeline_mode<synchronous>, transform_indices = @transform_3, window_bounds = array<i64: 128, 128>}, {pipeline_mode = #tpu.pipeline_mode<synchronous>, transform_indices = @transform_4, window_bounds = array<i64: 3, 128>}, {transform_indices = @transform_5, window_bounds = array<i64: 8, 128>}]} {
    %c0 = arith.constant 0 : index
    %c0_0 = arith.constant 0 : index
    %0 = vector.load %arg1[%c0, %c0_0] : memref<8x32xf32, #tpu.memory_space<vmem>>, vector<8x32xf32>
    %c0_1 = arith.constant 0 : index
    %c0_2 = arith.constant 0 : index
    %1 = vector.load %arg2[%c0_1, %c0_2] : memref<32x128xbf16, #tpu.memory_space<vmem>>, vector<32x128xbf16>
    %c0_3 = arith.constant 0 : index
    %c0_4 = arith.constant 0 : index
    %2 = vector.load %arg5[%c0_3, %c0_4] : memref<3x128xf32, #tpu.memory_space<vmem>>, vector<1x128xf32>
    %3 = arith.truncf %0 : vector<8x32xf32> to vector<8x32xbf16>
    %cst = arith.constant dense<0.000000e+00> : vector<8x128xf32>
    %4 = tpu.matmul %3, %1, %cst {dimension_numbers = #tpu.dot_dimension_numbers<[1], [0], [0], [1], [0, 0, 1, 1], [], []>} : vector<8x32xbf16>, vector<32x128xbf16>, vector<8x128xf32> -> vector<8x128xf32>
    %5 = vector.broadcast %2 : vector<1x128xf32> to vector<8x128xf32>
    %6 = arith.addf %4, %5 : vector<8x128xf32>
    %cst_5 = arith.constant 0.000000e+00 : f32
    %7 = vector.broadcast %cst_5 : f32 to vector<8x128xf32>
    %8 = arith.maximumf %6, %7 : vector<8x128xf32>
    %c0_6 = arith.constant 0 : index
    %c0_7 = arith.constant 0 : index
    %9 = vector.load %arg3[%c0_6, %c0_7] : memref<128x128xbf16, #tpu.memory_space<vmem>>, vector<128x128xbf16>
    %c1 = arith.constant 1 : index
    %c0_8 = arith.constant 0 : index
    %10 = vector.load %arg5[%c1, %c0_8] : memref<3x128xf32, #tpu.memory_space<vmem>>, vector<1x128xf32>
    %11 = arith.truncf %8 : vector<8x128xf32> to vector<8x128xbf16>
    %cst_9 = arith.constant dense<0.000000e+00> : vector<8x128xf32>
    %12 = tpu.matmul %11, %9, %cst_9 {dimension_numbers = #tpu.dot_dimension_numbers<[1], [0], [0], [1], [0, 0, 1, 1], [], []>} : vector<8x128xbf16>, vector<128x128xbf16>, vector<8x128xf32> -> vector<8x128xf32>
    %13 = vector.broadcast %10 : vector<1x128xf32> to vector<8x128xf32>
    %14 = arith.addf %12, %13 : vector<8x128xf32>
    %cst_10 = arith.constant 0.000000e+00 : f32
    %15 = vector.broadcast %cst_10 : f32 to vector<8x128xf32>
    %16 = arith.maximumf %14, %15 : vector<8x128xf32>
    %c0_11 = arith.constant 0 : index
    %c0_12 = arith.constant 0 : index
    %17 = vector.load %arg4[%c0_11, %c0_12] : memref<128x128xbf16, #tpu.memory_space<vmem>>, vector<128x128xbf16>
    %c2 = arith.constant 2 : index
    %c0_13 = arith.constant 0 : index
    %18 = vector.load %arg5[%c2, %c0_13] : memref<3x128xf32, #tpu.memory_space<vmem>>, vector<1x128xf32>
    %19 = arith.truncf %16 : vector<8x128xf32> to vector<8x128xbf16>
    %cst_14 = arith.constant dense<0.000000e+00> : vector<8x128xf32>
    %20 = tpu.matmul %19, %17, %cst_14 {dimension_numbers = #tpu.dot_dimension_numbers<[1], [0], [0], [1], [0, 0, 1, 1], [], []>} : vector<8x128xbf16>, vector<128x128xbf16>, vector<8x128xf32> -> vector<8x128xf32>
    %21 = vector.broadcast %18 : vector<1x128xf32> to vector<8x128xf32>
    %22 = arith.addf %20, %21 : vector<8x128xf32>
    %c0_15 = arith.constant 0 : index
    %c0_16 = arith.constant 0 : index
    %23 = vector.load %arg6[%c0_15, %c0_16] : memref<8x128xf32, #tpu.memory_space<vmem>>, vector<8x128xf32>
    tpu.vector_store %arg6[%c0_15, %c0_16], %22 {strides = array<i32>} : memref<8x128xf32, #tpu.memory_space<vmem>>, vector<8x128xf32>,
    return
  }
  func.func @transform_0(%arg0: i32) -> (i32, i32) {
    %c0_i32 = arith.constant 0 : i32
    %c0_i32_0 = arith.constant 0 : i32
    return %arg0, %c0_i32 : i32, i32
  }
  func.func @transform_1(%arg0: i32) -> (i32, i32) {
    %c0_i32 = arith.constant 0 : i32
    %c0_i32_0 = arith.constant 0 : i32
    %c0_i32_1 = arith.constant 0 : i32
    return %c0_i32, %c0_i32_0 : i32, i32
  }
  func.func @transform_2(%arg0: i32) -> (i32, i32) {
    %c0_i32 = arith.constant 0 : i32
    %c0_i32_0 = arith.constant 0 : i32
    %c0_i32_1 = arith.constant 0 : i32
    return %c0_i32, %c0_i32_0 : i32, i32
  }
  func.func @transform_3(%arg0: i32) -> (i32, i32) {
    %c0_i32 = arith.constant 0 : i32
    %c0_i32_0 = arith.constant 0 : i32
    %c0_i32_1 = arith.constant 0 : i32
    return %c0_i32, %c0_i32_0 : i32, i32
  }
  func.func @transform_4(%arg0: i32) -> (i32, i32) {
    %c0_i32 = arith.constant 0 : i32
    %c0_i32_0 = arith.constant 0 : i32
    %c0_i32_1 = arith.constant 0 : i32
    return %c0_i32, %c0_i32_0 : i32, i32
  }
  func.func @transform_5(%arg0: i32) -> (i32, i32) {
    %c0_i32 = arith.constant 0 : i32
    %c0_i32_0 = arith.constant 0 : i32
    return %arg0, %c0_i32 : i32, i32
  }
}

module attributes {stable_mosaic.version = 11 : i64} {
  func.func @_mlp_kernel(%arg0: i32, %arg1: memref<8x32xf32, #tpu.memory_space<vmem>>, %arg2: memref<32x128xbf16, #tpu.memory_space<vmem>>, %arg3: memref<128x128xbf16, #tpu.memory_space<vmem>>, %arg4: memref<128x128xbf16, #tpu.memory_space<vmem>>, %arg5: memref<3x128xf32, #tpu.memory_space<vmem>>, %arg6: memref<8x128xf32, #tpu.memory_space<vmem>>) attributes {dimension_semantics = [#tpu.dimension_semantics<parallel>], iteration_bounds = array<i64: 1>, scalar_prefetch = 0 : i64, scratch_operands = 0 : i64, tpu.core_type = #tpu.core_type<tc>, window_params = [{transform_indices = @transform_0, window_bounds = array<i64: 8, 32>}, {pipeline_mode = #tpu.pipeline_mode<synchronous>, transform_indices = @transform_1, window_bounds = array<i64: 32, 128>}, {pipeline_mode = #tpu.pipeline_mode<synchronous>, transform_indices = @transform_2, window_bounds = array<i64: 128, 128>}, {pipeline_mode = #tpu.pipeline_mode<synchronous>, transform_indices = @transform_3, window_bounds = array<i64: 128, 128>}, {pipeline_mode = #tpu.pipeline_mode<synchronous>, transform_indices = @transform_4, window_bounds = array<i64: 3, 128>}, {transform_indices = @transform_5, window_bounds = array<i64: 8, 128>}]} {
    %c0 = arith.constant 0 : index
    %c0_0 = arith.constant 0 : index
    %0 = vector.load %arg1[%c0, %c0_0] : memref<8x32xf32, #tpu.memory_space<vmem>>, vector<8x32xf32>
    %c0_1 = arith.constant 0 : index
    %c0_2 = arith.constant 0 : index
    %1 = vector.load %arg2[%c0_1, %c0_2] : memref<32x128xbf16, #tpu.memory_space<vmem>>, vector<32x128xbf16>
    %c0_3 = arith.constant 0 : index
    %c0_4 = arith.constant 0 : index
    %2 = vector.load %arg5[%c0_3, %c0_4] : memref<3x128xf32, #tpu.memory_space<vmem>>, vector<1x128xf32>
    %3 = arith.truncf %0 : vector<8x32xf32> to vector<8x32xbf16>
    %cst = arith.constant dense<0.000000e+00> : vector<8x128xf32>
    %4 = tpu.matmul %3, %1, %cst {dimension_numbers = #tpu.dot_dimension_numbers<[1], [0], [0], [1], [0, 0, 1, 1], [], []>} : vector<8x32xbf16>, vector<32x128xbf16>, vector<8x128xf32> -> vector<8x128xf32>
    %5 = vector.broadcast %2 : vector<1x128xf32> to vector<8x128xf32>
    %6 = arith.addf %4, %5 : vector<8x128xf32>
    %cst_5 = arith.constant 0.000000e+00 : f32
    %7 = vector.broadcast %cst_5 : f32 to vector<8x128xf32>
    %8 = arith.maximumf %6, %7 : vector<8x128xf32>
    %c0_6 = arith.constant 0 : index
    %c0_7 = arith.constant 0 : index
    %9 = vector.load %arg3[%c0_6, %c0_7] : memref<128x128xbf16, #tpu.memory_space<vmem>>, vector<128x128xbf16>
    %c1 = arith.constant 1 : index
    %c0_8 = arith.constant 0 : index
    %10 = vector.load %arg5[%c1, %c0_8] : memref<3x128xf32, #tpu.memory_space<vmem>>, vector<1x128xf32>
    %11 = arith.truncf %8 : vector<8x128xf32> to vector<8x128xbf16>
    %cst_9 = arith.constant dense<0.000000e+00> : vector<8x128xf32>
    %12 = tpu.matmul %11, %9, %cst_9 {dimension_numbers = #tpu.dot_dimension_numbers<[1], [0], [0], [1], [0, 0, 1, 1], [], []>} : vector<8x128xbf16>, vector<128x128xbf16>, vector<8x128xf32> -> vector<8x128xf32>
    %13 = vector.broadcast %10 : vector<1x128xf32> to vector<8x128xf32>
    %14 = arith.addf %12, %13 : vector<8x128xf32>
    %cst_10 = arith.constant 0.000000e+00 : f32
    %15 = vector.broadcast %cst_10 : f32 to vector<8x128xf32>
    %16 = arith.maximumf %14, %15 : vector<8x128xf32>
    %c0_11 = arith.constant 0 : index
    %c0_12 = arith.constant 0 : index
    %17 = vector.load %arg4[%c0_11, %c0_12] : memref<128x128xbf16, #tpu.memory_space<vmem>>, vector<128x128xbf16>
    %c2 = arith.constant 2 : index
    %c0_13 = arith.constant 0 : index
    %18 = vector.load %arg5[%c2, %c0_13] : memref<3x128xf32, #tpu.memory_space<vmem>>, vector<1x128xf32>
    %19 = arith.truncf %16 : vector<8x128xf32> to vector<8x128xbf16>
    %cst_14 = arith.constant dense<0.000000e+00> : vector<8x128xf32>
    %20 = tpu.matmul %19, %17, %cst_14 {dimension_numbers = #tpu.dot_dimension_numbers<[1], [0], [0], [1], [0, 0, 1, 1], [], []>} : vector<8x128xbf16>, vector<128x128xbf16>, vector<8x128xf32> -> vector<8x128xf32>
    %21 = vector.broadcast %18 : vector<1x128xf32> to vector<8x128xf32>
    %22 = arith.addf %20, %21 : vector<8x128xf32>
    %c0_15 = arith.constant 0 : index
    %c0_16 = arith.constant 0 : index
    %23 = vector.load %arg6[%c0_15, %c0_16] : memref<8x128xf32, #tpu.memory_space<vmem>>, vector<8x128xf32>
    tpu.vector_store %arg6[%c0_15, %c0_16], %22 {strides = array<i32>} : memref<8x128xf32, #tpu.memory_space<vmem>>, vector<8x128xf32>,
    return
  }
  func.func @transform_0(%arg0: i32) -> (i32, i32) {
    %c0_i32 = arith.constant 0 : i32
    %c0_i32_0 = arith.constant 0 : i32
    return %arg0, %c0_i32 : i32, i32
  }
  func.func @transform_1(%arg0: i32) -> (i32, i32) {
    %c0_i32 = arith.constant 0 : i32
    %c0_i32_0 = arith.constant 0 : i32
    %c0_i32_1 = arith.constant 0 : i32
    return %c0_i32, %c0_i32_0 : i32, i32
  }
  func.func @transform_2(%arg0: i32) -> (i32, i32) {
    %c0_i32 = arith.constant 0 : i32
    %c0_i32_0 = arith.constant 0 : i32
    %c0_i32_1 = arith.constant 0 : i32
    return %c0_i32, %c0_i32_0 : i32, i32
  }
  func.func @transform_3(%arg0: i32) -> (i32, i32) {
    %c0_i32 = arith.constant 0 : i32
    %c0_i32_0 = arith.constant 0 : i32
    %c0_i32_1 = arith.constant 0 : i32
    return %c0_i32, %c0_i32_0 : i32, i32
  }
  func.func @transform_4(%arg0: i32) -> (i32, i32) {
    %c0_i32 = arith.constant 0 : i32
    %c0_i32_0 = arith.constant 0 : i32
    %c0_i32_1 = arith.constant 0 : i32
    return %c0_i32, %c0_i32_0 : i32, i32
  }
  func.func @transform_5(%arg0: i32) -> (i32, i32) {
    %c0_i32 = arith.constant 0 : i32
    %c0_i32_0 = arith.constant 0 : i32
    return %arg0, %c0_i32 : i32, i32
  }
}

</mosaic_0001>

<bundles_post_ra>
// kernel: tpu_custom_call.1
= control target key start
LH: loop header
LB: loop body
LE: loop exit
PB: predicated region body
PF: predicated region fallthrough
CT: control target
= control target key end

     0   :  { %10 = vsyncpa [#allocation3], 0  ;;  %s704_s0 = inlined_call_operand.hbm [shape: f32[8,32], index: 0, kind: input, shape index: {}]   ;;  %s705_s1 = inlined_call_operand.hbm [shape: bf16[32,128], index: 1, kind: input, shape index: {}]   ;;  %s706_s2 = inlined_call_operand.hbm [shape: bf16[128,128], index: 2, kind: input, shape index: {}]   ;;  %s707_s3 = inlined_call_operand.hbm [shape: bf16[128,128], index: 3, kind: input, shape index: {}]   ;;  %s708_s4 = inlined_call_operand.vmem [shape: f32[3,128], index: 4, kind: input, shape index: {}]   ;;  %s709_s5 = inlined_call_operand.hbm [shape: f32[8,128], index: 5, kind: output, shape index: {}]  }
   0x1   :  { %11 = vsyncpa [#allocation6], 0 }
   0x2   :  { %12 = vsyncpa [#allocation9], 0 }
   0x3   :  { %13 = vsyncpa [#allocation4], 0  ;;  %s608_s18 = smov [#allocation5]  }
   0x4   :  { %s29_s19 = sshll.u32 %s608_s18, 4  ;;  %s30_s19 = int_to_ptr.vmem [resolvable:$true] %s29_s19 }
   0x5   :  { %s508_s20 = scalar_lea.vmem %s30_s19, 256  ;;  %p513_p1 = scmp.lt.s32.totalorder %s30_s19, %s30_s19 }
   0x6   :  { %p509_p0 = scmp.ne.s32.totalorder %s30_s19, %s508_s20  ;;  %p514_p2 = scmp.lt.s32.totalorder %s508_s20, %s508_s20 }
   0x8   :  { %p515_p3 = por %p514_p2, %p513_p1 }
   0xa   :  { %p516_p4 = pnand %p515_p3, %p509_p0 }
   0xc   :  { %519 = shalt.err (!%p516_p4)
}
   0xd   :  { %s609_s21 = smov 64   ;;  %s610_s22 = smov 4  }
   0xe   :  { %35 = dma.hbm_to_vmem [thread:$0]  %s705_s1, 256, %s30_s19, [#allocation6], %s609_s21, %s609_s21, %s610_s22  }
   0xf   :  { %s611_s25 = smov [#allocation2]   ;;  %s612_s27 = smov [#allocation7]  }
  0x10   :  { %s20_s26 = sshll.u32 %s611_s25, 4  ;;  %s41_s28 = sshll.u32 %s612_s27, 4  ;;  %s21_s26 = int_to_ptr.vmem [resolvable:$true] %s20_s26  ;;  %s42_s28 = int_to_ptr.vmem [resolvable:$true] %s41_s28 }
  0x11   :  { %s528_s29 = scalar_lea.vmem %s21_s26, 128  ;;  %p533_p6 = scmp.lt.s32.totalorder %s21_s26, %s21_s26 }
  0x12   :  { %p529_p5 = scmp.ne.s32.totalorder %s21_s26, %s528_s29  ;;  %p534_p7 = scmp.lt.s32.totalorder %s528_s29, %s528_s29 }
  0x14   :  { %p535_p8 = por %p534_p7, %p533_p6 }
  0x16   :  { %p536_p9 = pnand %p535_p8, %p529_p5 }
  0x18   :  { %539 = shalt.err (!%p536_p9)
}
  0x19   :  { %23 = dma.hbm_to_vmem [thread:$0]  %s704_s0, 128, %s21_s26, [#allocation3]  }
  0x1a   :  { %s548_s7 = scalar_lea.vmem %s42_s28, 1024  ;;  %p553_p11 = scmp.lt.s32.totalorder %s42_s28, %s42_s28 }
  0x1b   :  { %p549_p10 = scmp.ne.s32.totalorder %s42_s28, %s548_s7  ;;  %p554_p12 = scmp.lt.s32.totalorder %s548_s7, %s548_s7 }
  0x1d   :  { %p555_p13 = por %p554_p12, %p553_p11 }
  0x1f   :  { %p556_p0 = pnand %p555_p13, %p549_p10 }
  0x21   :  { %559 = shalt.err (!%p556_p0)
}
  0x22   :  { %47 = dma.hbm_to_vmem [thread:$0]  %s706_s2, 1024, %s42_s28, [#allocation6], %s609_s21, %s609_s21, %s610_s22  }
  0x23   :  { %s613_s9 = smov [#allocation8]  }
  0x24   :  { %s53_s10 = sshll.u32 %s613_s9, 4  ;;  %s54_s10 = int_to_ptr.vmem [resolvable:$true] %s53_s10 }
  0x25   :  { %s568_s11 = scalar_lea.vmem %s54_s10, 1024  ;;  %p573_p2 = scmp.lt.s32.totalorder %s54_s10, %s54_s10 }
  0x26   :  { %p569_p1 = scmp.ne.s32.totalorder %s54_s10, %s568_s11  ;;  %p574_p3 = scmp.lt.s32.totalorder %s568_s11, %s568_s11 }
  0x28   :  { %p575_p4 = por %p574_p3, %p573_p2 }
  0x2a   :  { %p576_p5 = pnand %p575_p4, %p569_p1 }
  0x2c   :  { %579 = shalt.err (!%p576_p5)
}
  0x2d   :  { %59 = dma.hbm_to_vmem [thread:$0]  %s707_s3, 1024, %s54_s10, [#allocation9], %s609_s21, %s609_s21, %s610_s22  }
  0x2e   :  { %600 = dma.done.wait [#allocation3], 128  }
  0x2f   :  { %601 = vsyncadd [#allocation3], 4294967168 }
  0x30   :  { %602 = dma.done.wait [#allocation6], 1280  }
  0x31   :  { %603 = vsyncadd [#allocation6], 4294966016 }
  0x32   :  { %604 = dma.done.wait [#allocation9], 1024  }
  0x33   :  { %605 = vsyncadd [#allocation9], 4294966272  ;;  %v614_v0 = vmov 0.0   ;;  %vm615_vm0 = vmmov 0   ;;  %v482_v1 = vld [vmem:[#allocation5 + $0x8] sm:$0xff]   ;;  %v483_v2 = vld [vmem:[#allocation5] sm:$0xff]  }
  0x34   :  { %425 = vmatprep.subr.bf16.mxu0 %v614_v0  ;;  %429 = vmatprep.mubr.msk.bf16.mxu0 %vm615_vm0, %v614_v0  ;;  %v75_v3 = vld [vmem:[#allocation2] sm:$0xff]  ;;  %v484_v4 = vld [vmem:[#allocation7 + $0x38] sm:$0xff]   ;;  %v485_v6 = vld [vmem:[#allocation7 + $0x30] sm:$0xff]   ;;  %vm98_vm1 = vcmask 261120   ;;  %s616_s17 = smov [#allocation10]  }
  0x35   :  { %433 = vmatprep.subr.bf16.mxu1 %v614_v0  ;;  %449 = vmatprep.mubr.msk.bf16.mxu1 %vm615_vm0, %v614_v0  ;;  %v81_v5 = vpack.c.bf16 %v75_v3, %v75_v3  ;;  %v486_v7 = vld [vmem:[#allocation7 + $0x28] sm:$0xff]   ;;  %v487_v8 = vld [vmem:[#allocation7 + $0x20] sm:$0xff]   ;;  %v488_v9 = vld [vmem:[#allocation7 + $0x18] sm:$0xff]   ;;  %s371_s18 = sshll.u32 %s616_s17, 4  ;;  %s372_s18 = int_to_ptr.vmem [resolvable:$true] %s371_s18 }
  0x36   :  { %426 = vmatpush3.bf16.msra.mxu0 %v482_v1  ;;  %434 = vmatpush3.bf16.msra.mxu1 %v484_v4  ;;  %v489_v10 = vld [vmem:[#allocation7 + $0x10] sm:$0xff]   ;;  %v490_v11 = vld [vmem:[#allocation7 + $0x8] sm:$0xff]   ;;  %v491_v12 = vld [vmem:[#allocation7] sm:$0xff]   ;;  %s580_s19 = scalar_lea.vmem %s372_s18, 128  ;;  %p585_p7 = scmp.lt.s32.totalorder %s372_s18, %s372_s18 }
  0x37   :  { %427 = vmatprep.subr.bf16.mxu0 %v614_v0  ;;  %435 = vmatprep.subr.bf16.mxu1 %v614_v0  ;;  %v492_v13 = vld [vmem:[#allocation8 + $0x38] sm:$0xff]   ;;  %v493_v14 = vld [vmem:[#allocation8 + $0x30] sm:$0xff]   ;;  %v494_v15 = vld [vmem:[#allocation8 + $0x28] sm:$0xff]   ;;  %p581_p6 = scmp.ne.s32.totalorder %s372_s18, %s580_s19  ;;  %p586_p8 = scmp.lt.s32.totalorder %s580_s19, %s580_s19 }
  0x38   :  { %v495_v16 = vld [vmem:[#allocation8 + $0x20] sm:$0xff]   ;;  %v496_v17 = vld [vmem:[#allocation8 + $0x18] sm:$0xff]   ;;  %v497_v18 = vld [vmem:[#allocation8 + $0x10] sm:$0xff]  }
  0x39   :  { %v382_v19 = vld [vmem:[%s708_s4] ss:$0 sm:$0xff]  ;;  %v499_v28 = vld [vmem:[#allocation8] sm:$0xff]   ;;  %v386_v29 = vld [vmem:[%s708_s4 + $0x1] ss:$0 sm:$0xff]  ;;  %p587_p9 = por %p586_p8, %p585_p7 }
  0x3a   :  { %428 = vmatpush3.bf16.msra.mxu0 %v483_v2  ;;  %436 = vmatpush3.bf16.msra.mxu1 %v485_v6  ;;  %v498_v27 = vld [vmem:[#allocation8 + $0x8] sm:$0xff]  }
  0x3b   :  { %453 = vmatprep.subr.bf16.mxu0 %v614_v0  ;;  %437 = vmatprep.subr.bf16.mxu1 %v614_v0  ;;  %v395_v37 = vld [vmem:[%s708_s4 + $0x2] ss:$0 sm:$0xff]  ;;  %p588_p10 = pnand %p587_p9, %p581_p6 }
  0x3d   :  { %430 = vmatmul.mubr.msk.bf16.vlgmr.msra.gmra.mxu0 %vm98_vm1, %v81_v5 }
  0x3e   :  { %469 = vmatprep.mubr.msk.bf16.mxu0 %vm615_vm0, %v614_v0  ;;  %438 = vmatpush3.bf16.msra.mxu1 %v486_v7 }
  0x3f   :  { %439 = vmatprep.subr.bf16.mxu1 %v614_v0  ;;  %454 = vmatpush3.bf16.msra.mxu0 %v492_v13 }
  0x40   :  { %455 = vmatprep.subr.bf16.mxu0 %v614_v0 }
  0x42   :  { %440 = vmatpush3.bf16.msra.mxu1 %v487_v8 }
  0x43   :  { %441 = vmatprep.subr.bf16.mxu1 %v614_v0  ;;  %456 = vmatpush3.bf16.msra.mxu0 %v493_v14 }
  0x44   :  { %457 = vmatprep.subr.bf16.mxu0 %v614_v0 }
  0x46   :  { %442 = vmatpush3.bf16.msra.mxu1 %v488_v9 }
  0x47   :  { %443 = vmatprep.subr.bf16.mxu1 %v614_v0  ;;  %458 = vmatpush3.bf16.msra.mxu0 %v494_v15 }
  0x48   :  { %459 = vmatprep.subr.bf16.mxu0 %v614_v0 }
  0x4a   :  { %444 = vmatpush3.bf16.msra.mxu1 %v489_v10 }
  0x4b   :  { %445 = vmatprep.subr.bf16.mxu1 %v614_v0  ;;  %460 = vmatpush3.bf16.msra.mxu0 %v495_v16 }
  0x4c   :  { %461 = vmatprep.subr.bf16.mxu0 %v614_v0 }
  0x4e   :  { %446 = vmatpush3.bf16.msra.mxu1 %v490_v11 }
  0x4f   :  { %447 = vmatprep.subr.bf16.mxu1 %v614_v0  ;;  %462 = vmatpush3.bf16.msra.mxu0 %v496_v17 }
  0x50   :  { %463 = vmatprep.subr.bf16.mxu0 %v614_v0 }
  0x52   :  { %448 = vmatpush3.bf16.msra.mxu1 %v491_v12 }
  0x53   :  { %464 = vmatpush3.bf16.msra.mxu0 %v497_v18 }
  0x54   :  { %465 = vmatprep.subr.bf16.mxu0 %v614_v0 }
  0x57   :  { %466 = vmatpush3.bf16.msra.mxu0 %v498_v27 }
  0x58   :  { %467 = vmatprep.subr.bf16.mxu0 %v614_v0 }
  0x5b   :  { %468 = vmatpush3.bf16.msra.mxu0 %v499_v28 }
  0xfd   :  { %v136_v20 = vpop.f32.mrf.mxu0 }
  0xfe   :  { %v137_v21 = vadd.f32 %v382_v19, %v136_v20 }
  0xff   :  { %v431_v22 = vpop.f32.mrf.mxu0 }
 0x100   :  { %v142_v23 = vmax.f32 %v137_v21, 0.0 }
 0x101   :  { %v139_v24 = vpop.f32.mrf.mxu0 }
 0x102   :  { %v160_v25 = vpack.c.bf16 %v142_v23, %v142_v23 }
 0x103   :  { %v432_v26 = vpop.f32.mrf.mxu0 }
 0x104   :  { %450 = vmatmul.mubr.bf16.vlgmr.msra.gmra.mxu1 %v160_v25 }
 0x1c4   :  { %v247_v30 = vpop.f32.mrf.mxu1 }
 0x1c5   :  { %v248_v31 = vadd.f32 %v386_v29, %v247_v30 }
 0x1c6   :  { %v451_v32 = vpop.f32.mrf.mxu1 }
 0x1c7   :  { %v253_v33 = vmax.f32 %v248_v31, 0.0 }
 0x1c8   :  { %v250_v34 = vpop.f32.mrf.mxu1 }
 0x1c9   :  { %v271_v35 = vpack.c.bf16 %v253_v33, %v253_v33 }
 0x1ca   :  { %v452_v36 = vpop.f32.mrf.mxu1 }
 0x1cb   :  { %470 = vmatmul.mubr.bf16.vlgmr.msra.gmra.mxu0 %v271_v35 }
 0x28b   :  { %v358_v38 = vpop.f32.mrf.mxu0 }
 0x28c   :  { %v359_v39 = vadd.f32 %v395_v37, %v358_v38 }
 0x28d   :  { %v471_v40 = vpop.f32.mrf.mxu0 }
 0x28e   :  { %364 = vst [vmem:[#allocation10] sm:$0xff] %v359_v39 }
 0x28f   :  { %v361_v41 = vpop.f32.mrf.mxu0 }
 0x290   :  { %591 = shalt.err (!%p588_p10)
}
 0x291   :  { %374 = dma.vmem_to_hbm [thread:$0]  %s372_s18, 128, %s709_s5, [#allocation4]   ;;  %v472_v42 = vpop.f32.mrf.mxu0 }
 0x292   :  { %606 = dma.done.wait [#allocation4], 128  }
 0x293   :  { %607 = vsyncadd [#allocation4], 4294967168 }
 0x294   :  { %378 = vsyncpa [#allocation3], 1 }
 0x295   :  { %379 = vsyncpa [#allocation6], 1 }
 0x296   :  { %380 = vsyncpa [#allocation9], 1 }
 0x297   :  { %381 = vsyncpa [#allocation4], 1 }

// kernel: tpu_custom_call.1
= control target key start
LH: loop header
LB: loop body
LE: loop exit
PB: predicated region body
PF: predicated region fallthrough
CT: control target
= control target key end

     0   :  { %10 = vsyncpa [#allocation3], 0  ;;  %s704_s0 = inlined_call_operand.hbm [shape: f32[8,32], index: 0, kind: input, shape index: {}]   ;;  %s705_s1 = inlined_call_operand.hbm [shape: bf16[32,128], index: 1, kind: input, shape index: {}]   ;;  %s706_s2 = inlined_call_operand.hbm [shape: bf16[128,128], index: 2, kind: input, shape index: {}]   ;;  %s707_s3 = inlined_call_operand.hbm [shape: bf16[128,128], index: 3, kind: input, shape index: {}]   ;;  %s708_s4 = inlined_call_operand.vmem [shape: f32[3,128], index: 4, kind: input, shape index: {}]   ;;  %s709_s5 = inlined_call_operand.hbm [shape: f32[8,128], index: 5, kind: output, shape index: {}]  }
   0x1   :  { %11 = vsyncpa [#allocation6], 0 }
   0x2   :  { %12 = vsyncpa [#allocation9], 0 }
   0x3   :  { %13 = vsyncpa [#allocation4], 0  ;;  %s608_s18 = smov [#allocation5]  }
   0x4   :  { %s29_s19 = sshll.u32 %s608_s18, 4  ;;  %s30_s19 = int_to_ptr.vmem [resolvable:$true] %s29_s19 }
   0x5   :  { %s508_s20 = scalar_lea.vmem %s30_s19, 256  ;;  %p513_p1 = scmp.lt.s32.totalorder %s30_s19, %s30_s19 }
   0x6   :  { %p509_p0 = scmp.ne.s32.totalorder %s30_s19, %s508_s20  ;;  %p514_p2 = scmp.lt.s32.totalorder %s508_s20, %s508_s20 }
   0x8   :  { %p515_p3 = por %p514_p2, %p513_p1 }
   0xa   :  { %p516_p4 = pnand %p515_p3, %p509_p0 }
   0xc   :  { %519 = shalt.err (!%p516_p4)
}
   0xd   :  { %s609_s21 = smov 64   ;;  %s610_s22 = smov 4  }
   0xe   :  { %35 = dma.hbm_to_vmem [thread:$0]  %s705_s1, 256, %s30_s19, [#allocation6], %s609_s21, %s609_s21, %s610_s22  }
   0xf   :  { %s611_s25 = smov [#allocation2]   ;;  %s612_s27 = smov [#allocation7]  }
  0x10   :  { %s20_s26 = sshll.u32 %s611_s25, 4  ;;  %s41_s28 = sshll.u32 %s612_s27, 4  ;;  %s21_s26 = int_to_ptr.vmem [resolvable:$true] %s20_s26  ;;  %s42_s28 = int_to_ptr.vmem [resolvable:$true] %s41_s28 }
  0x11   :  { %s528_s29 = scalar_lea.vmem %s21_s26, 128  ;;  %p533_p6 = scmp.lt.s32.totalorder %s21_s26, %s21_s26 }
  0x12   :  { %p529_p5 = scmp.ne.s32.totalorder %s21_s26, %s528_s29  ;;  %p534_p7 = scmp.lt.s32.totalorder %s528_s29, %s528_s29 }
  0x14   :  { %p535_p8 = por %p534_p7, %p533_p6 }
  0x16   :  { %p536_p9 = pnand %p535_p8, %p529_p5 }
  0x18   :  { %539 = shalt.err (!%p536_p9)
}
  0x19   :  { %23 = dma.hbm_to_vmem [thread:$0]  %s704_s0, 128, %s21_s26, [#allocation3]  }
  0x1a   :  { %s548_s7 = scalar_lea.vmem %s42_s28, 1024  ;;  %p553_p11 = scmp.lt.s32.totalorder %s42_s28, %s42_s28 }
  0x1b   :  { %p549_p10 = scmp.ne.s32.totalorder %s42_s28, %s548_s7  ;;  %p554_p12 = scmp.lt.s32.totalorder %s548_s7, %s548_s7 }
  0x1d   :  { %p555_p13 = por %p554_p12, %p553_p11 }
  0x1f   :  { %p556_p0 = pnand %p555_p13, %p549_p10 }
  0x21   :  { %559 = shalt.err (!%p556_p0)
}
  0x22   :  { %47 = dma.hbm_to_vmem [thread:$0]  %s706_s2, 1024, %s42_s28, [#allocation6], %s609_s21, %s609_s21, %s610_s22  }
  0x23   :  { %s613_s9 = smov [#allocation8]  }
  0x24   :  { %s53_s10 = sshll.u32 %s613_s9, 4  ;;  %s54_s10 = int_to_ptr.vmem [resolvable:$true] %s53_s10 }
  0x25   :  { %s568_s11 = scalar_lea.vmem %s54_s10, 1024  ;;  %p573_p2 = scmp.lt.s32.totalorder %s54_s10, %s54_s10 }
  0x26   :  { %p569_p1 = scmp.ne.s32.totalorder %s54_s10, %s568_s11  ;;  %p574_p3 = scmp.lt.s32.totalorder %s568_s11, %s568_s11 }
  0x28   :  { %p575_p4 = por %p574_p3, %p573_p2 }
  0x2a   :  { %p576_p5 = pnand %p575_p4, %p569_p1 }
  0x2c   :  { %579 = shalt.err (!%p576_p5)
}
  0x2d   :  { %59 = dma.hbm_to_vmem [thread:$0]  %s707_s3, 1024, %s54_s10, [#allocation9], %s609_s21, %s609_s21, %s610_s22  }
  0x2e   :  { %600 = dma.done.wait [#allocation3], 128  }
  0x2f   :  { %601 = vsyncadd [#allocation3], 4294967168 }
  0x30   :  { %602 = dma.done.wait [#allocation6], 1280  }
  0x31   :  { %603 = vsyncadd [#allocation6], 4294966016 }
  0x32   :  { %604 = dma.done.wait [#allocation9], 1024  }
  0x33   :  { %605 = vsyncadd [#allocation9], 4294966272  ;;  %v614_v0 = vmov 0.0   ;;  %vm615_vm0 = vmmov 0   ;;  %v482_v1 = vld [vmem:[#allocation5 + $0x8] sm:$0xff]   ;;  %v483_v2 = vld [vmem:[#allocation5] sm:$0xff]  }
  0x34   :  { %425 = vmatprep.subr.bf16.mxu0 %v614_v0  ;;  %429 = vmatprep.mubr.msk.bf16.mxu0 %vm615_vm0, %v614_v0  ;;  %v75_v3 = vld [vmem:[#allocation2] sm:$0xff]  ;;  %v484_v4 = vld [vmem:[#allocation7 + $0x38] sm:$0xff]   ;;  %v485_v6 = vld [vmem:[#allocation7 + $0x30] sm:$0xff]   ;;  %vm98_vm1 = vcmask 261120   ;;  %s616_s17 = smov [#allocation10]  }
  0x35   :  { %433 = vmatprep.subr.bf16.mxu1 %v614_v0  ;;  %449 = vmatprep.mubr.msk.bf16.mxu1 %vm615_vm0, %v614_v0  ;;  %v81_v5 = vpack.c.bf16 %v75_v3, %v75_v3  ;;  %v486_v7 = vld [vmem:[#allocation7 + $0x28] sm:$0xff]   ;;  %v487_v8 = vld [vmem:[#allocation7 + $0x20] sm:$0xff]   ;;  %v488_v9 = vld [vmem:[#allocation7 + $0x18] sm:$0xff]   ;;  %s371_s18 = sshll.u32 %s616_s17, 4  ;;  %s372_s18 = int_to_ptr.vmem [resolvable:$true] %s371_s18 }
  0x36   :  { %426 = vmatpush3.bf16.msra.mxu0 %v482_v1  ;;  %434 = vmatpush3.bf16.msra.mxu1 %v484_v4  ;;  %v489_v10 = vld [vmem:[#allocation7 + $0x10] sm:$0xff]   ;;  %v490_v11 = vld [vmem:[#allocation7 + $0x8] sm:$0xff]   ;;  %v491_v12 = vld [vmem:[#allocation7] sm:$0xff]   ;;  %s580_s19 = scalar_lea.vmem %s372_s18, 128  ;;  %p585_p7 = scmp.lt.s32.totalorder %s372_s18, %s372_s18 }
  0x37   :  { %427 = vmatprep.subr.bf16.mxu0 %v614_v0  ;;  %435 = vmatprep.subr.bf16.mxu1 %v614_v0  ;;  %v492_v13 = vld [vmem:[#allocation8 + $0x38] sm:$0xff]   ;;  %v493_v14 = vld [vmem:[#allocation8 + $0x30] sm:$0xff]   ;;  %v494_v15 = vld [vmem:[#allocation8 + $0x28] sm:$0xff]   ;;  %p581_p6 = scmp.ne.s32.totalorder %s372_s18, %s580_s19  ;;  %p586_p8 = scmp.lt.s32.totalorder %s580_s19, %s580_s19 }
  0x38   :  { %v495_v16 = vld [vmem:[#allocation8 + $0x20] sm:$0xff]   ;;  %v496_v17 = vld [vmem:[#allocation8 + $0x18] sm:$0xff]   ;;  %v497_v18 = vld [vmem:[#allocation8 + $0x10] sm:$0xff]  }
  0x39   :  { %v382_v19 = vld [vmem:[%s708_s4] ss:$0 sm:$0xff]  ;;  %v499_v28 = vld [vmem:[#allocation8] sm:$0xff]   ;;  %v386_v29 = vld [vmem:[%s708_s4 + $0x1] ss:$0 sm:$0xff]  ;;  %p587_p9 = por %p586_p8, %p585_p7 }
  0x3a   :  { %428 = vmatpush3.bf16.msra.mxu0 %v483_v2  ;;  %436 = vmatpush3.bf16.msra.mxu1 %v485_v6  ;;  %v498_v27 = vld [vmem:[#allocation8 + $0x8] sm:$0xff]  }
  0x3b   :  { %453 = vmatprep.subr.bf16.mxu0 %v614_v0  ;;  %437 = vmatprep.subr.bf16.mxu1 %v614_v0  ;;  %v395_v37 = vld [vmem:[%s708_s4 + $0x2] ss:$0 sm:$0xff]  ;;  %p588_p10 = pnand %p587_p9, %p581_p6 }
  0x3d   :  { %430 = vmatmul.mubr.msk.bf16.vlgmr.msra.gmra.mxu0 %vm98_vm1, %v81_v5 }
  0x3e   :  { %469 = vmatprep.mubr.msk.bf16.mxu0 %vm615_vm0, %v614_v0  ;;  %438 = vmatpush3.bf16.msra.mxu1 %v486_v7 }
  0x3f   :  { %439 = vmatprep.subr.bf16.mxu1 %v614_v0  ;;  %454 = vmatpush3.bf16.msra.mxu0 %v492_v13 }
  0x40   :  { %455 = vmatprep.subr.bf16.mxu0 %v614_v0 }
  0x42   :  { %440 = vmatpush3.bf16.msra.mxu1 %v487_v8 }
  0x43   :  { %441 = vmatprep.subr.bf16.mxu1 %v614_v0  ;;  %456 = vmatpush3.bf16.msra.mxu0 %v493_v14 }
  0x44   :  { %457 = vmatprep.subr.bf16.mxu0 %v614_v0 }
  0x46   :  { %442 = vmatpush3.bf16.msra.mxu1 %v488_v9 }
  0x47   :  { %443 = vmatprep.subr.bf16.mxu1 %v614_v0  ;;  %458 = vmatpush3.bf16.msra.mxu0 %v494_v15 }
  0x48   :  { %459 = vmatprep.subr.bf16.mxu0 %v614_v0 }
  0x4a   :  { %444 = vmatpush3.bf16.msra.mxu1 %v489_v10 }
  0x4b   :  { %445 = vmatprep.subr.bf16.mxu1 %v614_v0  ;;  %460 = vmatpush3.bf16.msra.mxu0 %v495_v16 }
  0x4c   :  { %461 = vmatprep.subr.bf16.mxu0 %v614_v0 }
  0x4e   :  { %446 = vmatpush3.bf16.msra.mxu1 %v490_v11 }
  0x4f   :  { %447 = vmatprep.subr.bf16.mxu1 %v614_v0  ;;  %462 = vmatpush3.bf16.msra.mxu0 %v496_v17 }
  0x50   :  { %463 = vmatprep.subr.bf16.mxu0 %v614_v0 }
  0x52   :  { %448 = vmatpush3.bf16.msra.mxu1 %v491_v12 }
  0x53   :  { %464 = vmatpush3.bf16.msra.mxu0 %v497_v18 }
  0x54   :  { %465 = vmatprep.subr.bf16.mxu0 %v614_v0 }
  0x57   :  { %466 = vmatpush3.bf16.msra.mxu0 %v498_v27 }
  0x58   :  { %467 = vmatprep.subr.bf16.mxu0 %v614_v0 }
  0x5b   :  { %468 = vmatpush3.bf16.msra.mxu0 %v499_v28 }
  0xfd   :  { %v136_v20 = vpop.f32.mrf.mxu0 }
  0xfe   :  { %v137_v21 = vadd.f32 %v382_v19, %v136_v20 }
  0xff   :  { %v431_v22 = vpop.f32.mrf.mxu0 }
 0x100   :  { %v142_v23 = vmax.f32 %v137_v21, 0.0 }
 0x101   :  { %v139_v24 = vpop.f32.mrf.mxu0 }
 0x102   :  { %v160_v25 = vpack.c.bf16 %v142_v23, %v142_v23 }
 0x103   :  { %v432_v26 = vpop.f32.mrf.mxu0 }
 0x104   :  { %450 = vmatmul.mubr.bf16.vlgmr.msra.gmra.mxu1 %v160_v25 }
 0x1c4   :  { %v247_v30 = vpop.f32.mrf.mxu1 }
 0x1c5   :  { %v248_v31 = vadd.f32 %v386_v29, %v247_v30 }
 0x1c6   :  { %v451_v32 = vpop.f32.mrf.mxu1 }
 0x1c7   :  { %v253_v33 = vmax.f32 %v248_v31, 0.0 }
 0x1c8   :  { %v250_v34 = vpop.f32.mrf.mxu1 }
 0x1c9   :  { %v271_v35 = vpack.c.bf16 %v253_v33, %v253_v33 }
 0x1ca   :  { %v452_v36 = vpop.f32.mrf.mxu1 }
 0x1cb   :  { %470 = vmatmul.mubr.bf16.vlgmr.msra.gmra.mxu0 %v271_v35 }
 0x28b   :  { %v358_v38 = vpop.f32.mrf.mxu0 }
 0x28c   :  { %v359_v39 = vadd.f32 %v395_v37, %v358_v38 }
 0x28d   :  { %v471_v40 = vpop.f32.mrf.mxu0 }
 0x28e   :  { %364 = vst [vmem:[#allocation10] sm:$0xff] %v359_v39 }
 0x28f   :  { %v361_v41 = vpop.f32.mrf.mxu0 }
 0x290   :  { %591 = shalt.err (!%p588_p10)
}
 0x291   :  { %374 = dma.vmem_to_hbm [thread:$0]  %s372_s18, 128, %s709_s5, [#allocation4]   ;;  %v472_v42 = vpop.f32.mrf.mxu0 }
 0x292   :  { %606 = dma.done.wait [#allocation4], 128  }
 0x293   :  { %607 = vsyncadd [#allocation4], 4294967168 }
 0x294   :  { %378 = vsyncpa [#allocation3], 1 }
 0x295   :  { %379 = vsyncpa [#allocation6], 1 }
 0x296   :  { %380 = vsyncpa [#allocation9], 1 }
 0x297   :  { %381 = vsyncpa [#allocation4], 1 }

</bundles_post_ra>
